<compile_context>
chip_gen: v7x
topology: tpu7x:2x2x1
jax: 0.10.0
libtpu: 0.0.40
codegen_flags: <defaults>
</compile_context>

<pallas_src>
import jax
import jax.numpy as jnp
from jax import lax
from jax.experimental import pallas as pl
from jax.experimental.pallas import tpu as pltpu


def _round_up(n, m):
    return ((n + m - 1) // m) * m


def _linear_kernel(x_ref, w_ref, b_ref, o_ref):
    # x_ref: (bb, D) VMEM (streamed, double-buffered)
    # w_ref: (1, D)  VMEM (same block every step -> grid-resident)
    # b_ref: (1, 1)  SMEM scalar
    # o_ref: (1, bb) VMEM lane-dense output row
    x = x_ref[...]
    w = w_ref[...]
    acc = lax.dot_general(
        w, x,
        dimension_numbers=(((1,), (1,)), ((), ())),   # contract D -> (1, bb)
        preferred_element_type=jnp.float32,
        precision=lax.Precision.HIGHEST,              # keep full f32 accuracy
    )
    o_ref[...] = (acc + b_ref[0, 0]).astype(o_ref.dtype)


def _tpu_tuning():
    """Return (x_tile_byte_cap, vmem_limit_bytes_or_None, want_core_parallel)."""
    try:
        kind = jax.devices()[0].device_kind.lower()
    except Exception:
        kind = ""
    if "v5" in kind:          # v5e/v5p: smallest scoped-VMEM defaults, ~0.8 TB/s HBM
        return 3 * 2**20, 64 * 2**20, False
    if "v6" in kind:          # v6e: 128 MiB physical VMEM, ~1.4 TB/s HBM
        return 12 * 2**20, 64 * 2**20, False
    if "7" in kind:           # v7x: 64 MiB VMEM / TC, ~3.2 TB/s / TC, 2 TensorCores
        return 12 * 2**20, 48 * 2**20, True
    # Unknown generation: stay inside every default scoped-VMEM budget.
    return 3 * 2**20, None, False


def linear_regression_forward(x, weight, bias, *, block_batch=None):
    """
    x:      (batch, input_dim)  float32
    weight: (1, input_dim)      float32  (PyTorch nn.Linear layout)
    bias:   (1,)                float32
    returns (batch, 1)          float32
    """
    batch, input_dim = x.shape
    x = x.astype(jnp.float32)
    w_row = weight.reshape(1, input_dim).astype(jnp.float32)   # lane-dense weight row
    b = bias.reshape(1, 1).astype(jnp.float32)                 # SMEM scalar

    tile_cap, vmem_limit, want_core_parallel = _tpu_tuning()

    # ---- VMEM accounting with (8, 128) sublane/lane padding -----------------
    d_pad = _round_up(input_dim, 128)
    row_bytes = 4 * d_pad                                      # one lane-padded f32 x row

    def vmem_use(bb_):
        x_bytes = 2 * bb_ * row_bytes          # double-buffered x tiles
        out_bytes = 2 * 8 * bb_ * 4            # (1, bb) pads to (8, bb), double-buffered
        w_bytes = 8 * d_pad * 4                # resident (1, D) -> (8, d_pad) weight tile
        return x_bytes + out_bytes + w_bytes

    if block_batch is None:
        bb = max(128, (tile_cap // row_bytes) // 128 * 128)
        budget = (vmem_limit if vmem_limit is not None else 16 * 2**20) - 2 * 2**20
        while bb > 128 and vmem_use(bb) > budget:
            bb -= 128
        # TODO(synk): for input_dim so large that even bb=128 exceeds the VMEM
        # budget, split the feature dimension over a second ("arbitrary") grid
        # axis with an f32 accumulator.
        bb = min(bb, _round_up(batch, 128))
    else:
        bb = block_batch

    # Ragged last tile: zero-pad the batch, slice the padding off afterwards.
    padded_batch = _round_up(batch, bb)
    if padded_batch != batch:
        x = jnp.pad(x, ((0, padded_batch - batch), (0, 0)))
    grid = (padded_batch // bb,)

    cost = pl.CostEstimate(
        flops=2 * padded_batch * input_dim,
        transcendentals=0,
        bytes_accessed=4 * (padded_batch * input_dim + input_dim + padded_batch + 1),
    )

    def build(dim_sem):
        return pl.pallas_call(
            _linear_kernel,
            out_shape=jax.ShapeDtypeStruct((1, padded_batch), jnp.float32),
            grid_spec=pltpu.PrefetchScalarGridSpec(
                num_scalar_prefetch=0,
                grid=grid,
                in_specs=[
                    # x: streamed per batch tile (double-buffered by Pallas).
                    pl.BlockSpec((bb, input_dim), lambda i: (i, 0)),
                    # weight: same block every step -> stays VMEM-resident.
                    pl.BlockSpec((1, input_dim), lambda i: (0, 0)),
                    # bias: whole (1, 1) array in SMEM, read as a scalar.
                    pl.BlockSpec(memory_space=pltpu.SMEM),
                ],
                # Lane-dense output row: full-width stores, dense writeback DMA.
                out_specs=pl.BlockSpec((1, bb), lambda i: (0, i)),
            ),
            compiler_params=pltpu.CompilerParams(
                dimension_semantics=(dim_sem,),
                vmem_limit_bytes=vmem_limit,
            ),
            cost_estimate=cost,
        )

    # On v7x, try to split the (independent) batch tiles across both
    # TensorCores; fall back to plain "parallel" if CORE_PARALLEL is rejected.
    semantics = []
    if want_core_parallel and grid[0] >= 2:
        semantics.append(pltpu.CORE_PARALLEL)
    semantics.append(pltpu.PARALLEL)

    out_row = None
    last_err = None
    for sem in semantics:
        try:
            out_row = jax.block_until_ready(build(sem)(x, w_row, b))
            break
        except Exception as e:   # e.g. CORE_PARALLEL unsupported on this build
            last_err = e
    if out_row is None:
        raise last_err

    # (1, padded_batch) -> (batch, 1); padded rows (== bias) never reach caller.
    return out_row.reshape(padded_batch, 1)[:batch]


if __name__ == "__main__":
    key = jax.random.PRNGKey(0)
    kx, kw, kb = jax.random.split(key, 3)

    batch, input_dim = 8, 32
    x = jax.random.normal(kx, (batch, input_dim), dtype=jnp.float32)
    # Deterministic parameters with nn.Linear(input_dim, 1) shapes.
    weight = jax.random.normal(kw, (1, input_dim), dtype=jnp.float32) * 0.1
    bias = jax.random.normal(kb, (1,), dtype=jnp.float32) * 0.1

    y = linear_regression_forward(x, weight, bias)
    y = jax.block_until_ready(y)

    # Exact-f32 reference (elementwise mul + reduce): x @ W^T + b
    y_ref = jnp.sum(x * weight, axis=-1, keepdims=True) + bias.reshape(1, 1)
    assert y.shape == (batch, 1)
    assert jnp.allclose(y, y_ref, atol=1e-4, rtol=1e-4)

    print("KERNEL_OK")
</pallas_src>

<mosaic_0001>
module attributes {stable_mosaic.version = 11 : i64} {
  func.func @_linear_kernel(%arg0: i32, %arg1: memref<128x32xf32, #tpu.memory_space<vmem>>, %arg2: memref<1x32xf32, #tpu.memory_space<vmem>>, %arg3: memref<1x1xf32, #tpu.memory_space<smem>>, %arg4: memref<1x128xf32, #tpu.memory_space<vmem>>) attributes {dimension_semantics = [#tpu.dimension_semantics<parallel>], iteration_bounds = array<i64: 1>, scalar_prefetch = 0 : i64, scratch_operands = 0 : i64, tpu.core_type = #tpu.core_type<tc>, window_params = [{transform_indices = @transform_0, window_bounds = array<i64: 128, 32>}, {pipeline_mode = #tpu.pipeline_mode<synchronous>, transform_indices = @transform_1, window_bounds = array<i64: 1, 32>}, {transform_indices = @transform_2, window_bounds = array<i64: 1, 1>}, {transform_indices = @transform_3, window_bounds = array<i64: 1, 128>}]} {
    %c0 = arith.constant 0 : index
    %c0_0 = arith.constant 0 : index
    %0 = vector.load %arg1[%c0, %c0_0] : memref<128x32xf32, #tpu.memory_space<vmem>>, vector<128x32xf32>
    %c0_1 = arith.constant 0 : index
    %c0_2 = arith.constant 0 : index
    %1 = vector.load %arg2[%c0_1, %c0_2] : memref<1x32xf32, #tpu.memory_space<vmem>>, vector<1x32xf32>
    %cst = arith.constant dense<0.000000e+00> : vector<1x128xf32>
    %2 = tpu.matmul %1, %0, %cst {dimension_numbers = #tpu.dot_dimension_numbers<[1], [1], [0], [0], [0, 0, 1, 0], [], []>, precision = #tpu.contract_precision<fp32>} : vector<1x32xf32>, vector<128x32xf32>, vector<1x128xf32> -> vector<1x128xf32>
    %c0_3 = arith.constant 0 : index
    %c0_4 = arith.constant 0 : index
    %3 = memref.load %arg3[%c0_3, %c0_4] : memref<1x1xf32, #tpu.memory_space<smem>>
    %4 = vector.broadcast %3 : f32 to vector<1x128xf32>
    %5 = arith.addf %2, %4 : vector<1x128xf32>
    %c0_5 = arith.constant 0 : index
    %c0_6 = arith.constant 0 : index
    %6 = vector.load %arg4[%c0_5, %c0_6] : memref<1x128xf32, #tpu.memory_space<vmem>>, vector<1x128xf32>
    tpu.vector_store %arg4[%c0_5, %c0_6], %5 {strides = array<i32>} : memref<1x128xf32, #tpu.memory_space<vmem>>, vector<1x128xf32>,
    return
  }
  func.func @transform_0(%arg0: i32) -> (i32, i32) {
    %c0_i32 = arith.constant 0 : i32
    %c0_i32_0 = arith.constant 0 : i32
    return %arg0, %c0_i32 : i32, i32
  }
  func.func @transform_1(%arg0: i32) -> (i32, i32) {
    %c0_i32 = arith.constant 0 : i32
    %c0_i32_0 = arith.constant 0 : i32
    %c0_i32_1 = arith.constant 0 : i32
    return %c0_i32, %c0_i32_0 : i32, i32
  }
  func.func @transform_2(%arg0: i32) -> (i32, i32) {
    %c0_i32 = arith.constant 0 : i32
    %c0_i32_0 = arith.constant 0 : i32
    %c0_i32_1 = arith.constant 0 : i32
    return %c0_i32, %c0_i32_0 : i32, i32
  }
  func.func @transform_3(%arg0: i32) -> (i32, i32) {
    %c0_i32 = arith.constant 0 : i32
    %c0_i32_0 = arith.constant 0 : i32
    return %c0_i32, %arg0 : i32, i32
  }
}

</mosaic_0001>

<bundles_post_ra>
// kernel: tpu_custom_call.1
= control target key start
LH: loop header
LB: loop body
LE: loop exit
PB: predicated region body
PF: predicated region fallthrough
CT: control target
= control target key end

     0   :  { %vm35_vm0 = vcmask 261120   ;;  %v1237_v3 = vmov 0.0|0.0   ;;  %s1559_s0 = inlined_call_operand.vmem [shape: f32[128,32], index: 0, kind: input, shape index: {}]   ;;  %s1560_s1 = inlined_call_operand.vmem [shape: f32[1,32], index: 1, kind: input, shape index: {}]   ;;  %s1561_s2 = inlined_call_operand.<no memory space> [shape: f32[1,1], index: 2, kind: input, shape index: {}]   ;;  %s1562_s3 = inlined_call_operand.hbm [shape: f32[1,128], index: 3, kind: output, shape index: {}]  }
   0x1   :  { %v16_v0 = vld [vmem:[%s1559_s0] sm:$0xff]  ;;  %v17_v1 = vld [vmem:[%s1559_s0 + $0x8] sm:$0xff]  ;;  %v18_v2 = vld [vmem:[%s1559_s0 + $0x10] sm:$0xff]  ;;  %1055 = vmatprep.subr.bf16.mxu1 %v1237_v3  ;;  %1127 = vmatprep.subr.bf16.mxu0 %v1237_v3 }
   0x2   :  { %v40_v4 = vsel %vm35_vm0, %v16_v0, 0  ;;  %v43_v5 = vsel %vm35_vm0, %v17_v1, 0  ;;  %v19_v6 = vld [vmem:[%s1559_s0 + $0x18] sm:$0xff]  ;;  %v46_v9 = vsel %vm35_vm0, %v18_v2, 0 }
   0x3   :  { %v88_v7 = vand.u32 4294901760, %v40_v4  ;;  %v91_v8 = vand.u32 4294901760, %v43_v5  ;;  %v49_v10 = vsel %vm35_vm0, %v19_v6, 0  ;;  %v94_v12 = vand.u32 4294901760, %v46_v9 }
   0x4   :  { %v97_v13 = vand.u32 4294901760, %v49_v10 }
   0x5   :  { %v1279_v11 = vpack.c.bf16 %v91_v8, %v88_v7 }
   0x7   :  { %1057 = vmatpush3.bf16.xpose.msra.mxu1 %v1279_v11  ;;  %1129 = vmatpush3.bf16.xpose.msra.mxu0 %v1279_v11 }
   0x8   :  { %1058 = vmatprep.subr.bf16.mxu1 %v1237_v3  ;;  %1130 = vmatprep.subr.bf16.mxu0 %v1237_v3 }
   0x9   :  { %9 = vsyncpa [#allocation4], 0  ;;  %v20_v14 = vld [vmem:[%s1559_s0 + $0x20] sm:$0xff]  ;;  %v21_v15 = vld [vmem:[%s1559_s0 + $0x28] sm:$0xff]  ;;  %v1291_v16 = vpack.c.bf16 %v97_v13, %v94_v12  ;;  %vm1238_vm1 = vmmov 0   ;;  %v1239_v23 = vmov 0.0   ;;  %v1327_v34 = vsub.f32 %v40_v4, %v88_v7 }
   0xa   :  { %v52_v17 = vsel %vm35_vm0, %v20_v14, 0  ;;  %v55_v18 = vsel %vm35_vm0, %v21_v15, 0  ;;  %v22_v21 = vld [vmem:[%s1559_s0 + $0x30] sm:$0xff]  ;;  %v23_v22 = vld [vmem:[%s1559_s0 + $0x38] sm:$0xff]  ;;  %877 = vmatprep.mubr.msk.f32.mxu1 %vm1238_vm1, %v1239_v23  ;;  %982 = vmatprep.mubr.msk.f32.mxu0 %vm1238_vm1, %v1239_v23  ;;  %v24_v29 = vld [vmem:[%s1559_s0 + $0x40] sm:$0xff]  ;;  %v1329_v35 = vsub.f32 %v43_v5, %v91_v8  ;;  %v1331_v36 = vsub.f32 %v46_v9, %v94_v12  ;;  %s1240_s19 = smov [#allocation3]  }
   0xb   :  { %v100_v19 = vand.u32 4294901760, %v52_v17  ;;  %v103_v20 = vand.u32 4294901760, %v55_v18  ;;  %v58_v25 = vsel %vm35_vm0, %v22_v21, 0  ;;  %v61_v26 = vsel %vm35_vm0, %v23_v22, 0  ;;  %v25_v30 = vld [vmem:[%s1559_s0 + $0x48] sm:$0xff]  ;;  %v26_v43 = vld [vmem:[%s1559_s0 + $0x50] sm:$0xff] }
   0xc   :  { %v106_v27 = vand.u32 4294901760, %v58_v25  ;;  %v109_v28 = vand.u32 4294901760, %v61_v26  ;;  %v64_v31 = vsel %vm35_vm0, %v24_v29, 0  ;;  %v67_v33 = vsel %vm35_vm0, %v25_v30, 0  ;;  %v27_v44 = vld [vmem:[%s1559_s0 + $0x58] sm:$0xff]  ;;  %v28_v60 = vld [vmem:[%s1559_s0 + $0x60] sm:$0xff] }
   0xd   :  { %v1309_v24 = vpack.c.bf16 %v103_v20, %v100_v19  ;;  %v1333_v37 = vsub.f32 %v49_v10, %v97_v13  ;;  %v112_v38 = vand.u32 4294901760, %v64_v31  ;;  %v1335_v39 = vsub.f32 %v52_v17, %v100_v19  ;;  %v29_v61 = vld [vmem:[%s1559_s0 + $0x68] sm:$0xff]  ;;  %v32_v5 = vld [vmem:[%s1560_s1] sm:$0x1]  ;;  %v30_v8 = vld [vmem:[%s1559_s0 + $0x70] sm:$0xff]  ;;  %s735_s20 = sshll.u32 %s1240_s19, 4  ;;  %s736_s20 = int_to_ptr.vmem [resolvable:$true] %s735_s20 }
   0xe   :  { %v1324_v32 = vpack.c.bf16 %v109_v28, %v106_v27  ;;  %v1337_v40 = vsub.f32 %v55_v18, %v103_v20  ;;  %v1339_v41 = vsub.f32 %v58_v25, %v106_v27  ;;  %v115_v42 = vand.u32 4294901760, %v67_v33  ;;  %v31_v9 = vld [vmem:[%s1559_s0 + $0x78] sm:$0xff]  ;;  %s1213_s21 = scalar_lea.vmem %s736_s20, 16  ;;  %s1217_s22 = scalar_lea.vmem %s736_s20, 32 }
   0xf   :  { %1060 = vmatpush3.bf16.xpose.msra.mxu1 %v1291_v16  ;;  %1132 = vmatpush3.bf16.xpose.msra.mxu0 %v1291_v16  ;;  %v1348_v45 = vsub.f32 %v61_v26, %v109_v28  ;;  %v1351_v46 = vsub.f32 %v64_v31, %v112_v38  ;;  %v1104_v47 = vpack.c.bf16 %v1329_v35, %v1327_v34  ;;  %v70_v51 = vsel %vm35_vm0, %v26_v43, 0  ;;  %p1214_p0 = scmp.ne.s32.totalorder %s736_s20, %s1213_s21  ;;  %p1218_p1 = scmp.lt.s32.totalorder %s736_s20, %s736_s20 }
  0x10   :  { %1061 = vmatprep.subr.bf16.mxu1 %v1237_v3  ;;  %1133 = vmatprep.subr.bf16.mxu0 %v1237_v3  ;;  %v1357_v48 = vsub.f32 %v67_v33, %v115_v42  ;;  %v1107_v49 = vpack.c.bf16 %v1333_v37, %v1331_v36  ;;  %v1110_v50 = vpack.c.bf16 %v1337_v40, %v1335_v39  ;;  %v73_v52 = vsel %vm35_vm0, %v27_v44, 0  ;;  %p1219_p2 = scmp.lt.s32.totalorder %s1217_s22, %s1213_s21 }
  0x11   :  { %v1113_v53 = vpack.c.bf16 %v1348_v45, %v1339_v41  ;;  %v1369_v55 = vpack.c.bf16 %v115_v42, %v112_v38  ;;  %v118_v56 = vand.u32 4294901760, %v70_v51  ;;  %v121_v57 = vand.u32 4294901760, %v73_v52 }
  0x12   :  { %v1116_v54 = vpack.c.bf16 %v1357_v48, %v1351_v46  ;;  %v76_v63 = vsel %vm35_vm0, %v28_v60, 0  ;;  %v79_v0 = vsel %vm35_vm0, %v29_v61, 0  ;;  %v37_v10 = vsel %vm35_vm0, %v32_v5, 0  ;;  %p1220_p3 = por %p1219_p2, %p1218_p1 }
  0x13   :  { %v1371_v58 = vsub.f32 %v70_v51, %v118_v56  ;;  %v1373_v59 = vsub.f32 %v73_v52, %v121_v57  ;;  %v1389_v1 = vpack.c.bf16 %v121_v57, %v118_v56  ;;  %v124_v2 = vand.u32 4294901760, %v76_v63 }
  0x14   :  { %v127_v4 = vand.u32 4294901760, %v79_v0  ;;  %v82_v13 = vsel %vm35_vm0, %v30_v8, 0  ;;  %v85_v14 = vsel %vm35_vm0, %v31_v9, 0  ;;  %v1413_v15 = vand.u32 4294901760, %v37_v10  ;;  %p1221_p4 = pnand %p1220_p3, %p1214_p0 }
  0x15   :  { %v1119_v62 = vpack.c.bf16 %v1373_v59, %v1371_v58  ;;  %v1394_v6 = vsub.f32 %v76_v63, %v124_v2  ;;  %v130_v18 = vand.u32 4294901760, %v82_v13  ;;  %v133_v19 = vand.u32 4294901760, %v85_v14 }
  0x16   :  { %v1396_v7 = vsub.f32 %v79_v0, %v127_v4  ;;  %v1415_v17 = vpack.c.bf16 %v127_v4, %v124_v2  ;;  %v1422_v22 = vsub.f32 %v37_v10, %v1413_v15  ;;  %v181_v25 = vand.u32 4294901760, %v1327_v34 }
  0x17   :  { %1063 = vmatpush3.bf16.xpose.msra.mxu1 %v1309_v24  ;;  %1135 = vmatpush3.bf16.xpose.msra.mxu0 %v1309_v24  ;;  %v1417_v20 = vsub.f32 %v82_v13, %v130_v18  ;;  %v1419_v21 = vsub.f32 %v85_v14, %v133_v19  ;;  %v188_v26 = vand.u32 4294901760, %v1329_v35  ;;  %v1433_v29 = vpack.c.bf16 %v133_v19, %v130_v18 }
  0x18   :  { %1064 = vmatprep.subr.bf16.mxu1 %v1237_v3  ;;  %1136 = vmatprep.subr.bf16.mxu0 %v1237_v3  ;;  %v1122_v12 = vpack.c.bf16 %v1396_v7, %v1394_v6  ;;  %v170_v28 = vand.u32 4294901760, %v1422_v22  ;;  %v182_v30 = vsub.f32 %v1327_v34, %v181_v25  ;;  %v195_v43 = vand.u32 4294901760, %v1331_v36 }
  0x19   :  { %v1125_v27 = vpack.c.bf16 %v1419_v21, %v1417_v20  ;;  %v189_v31 = vsub.f32 %v1329_v35, %v188_v26  ;;  %v202_v44 = vand.u32 4294901760, %v1333_v37  ;;  %v1152_v56 = vpack.c.bf16 %v188_v26, %v181_v25 }
  0x1a   :  { %v171_v33 = vsub.f32 %v1422_v22, %v170_v28  ;;  %v183_v38 = vand.u32 4294901760, %v182_v30  ;;  %v196_v57 = vsub.f32 %v1331_v36, %v195_v43  ;;  %v209_v0 = vand.u32 4294901760, %v1335_v39 }
  0x1b   :  { %v190_v42 = vand.u32 4294901760, %v189_v31  ;;  %v203_v60 = vsub.f32 %v1333_v37, %v202_v44  ;;  %v216_v2 = vand.u32 4294901760, %v1337_v40  ;;  %v1155_v5 = vpack.c.bf16 %v202_v44, %v195_v43 }
  0x1c   :  { %v172_v51 = vand.u32 4294901760, %v171_v33  ;;  %v197_v61 = vand.u32 4294901760, %v196_v57  ;;  %v210_v8 = vsub.f32 %v1335_v39, %v209_v0  ;;  %v223_v14 = vand.u32 4294901760, %v1339_v41 }
  0x1d   :  { %v1080_v52 = vpack.c.bf16 %v190_v42, %v183_v38  ;;  %v204_v63 = vand.u32 4294901760, %v203_v60  ;;  %v217_v9 = vsub.f32 %v1337_v40, %v216_v2  ;;  %v230_v18 = vand.u32 4294901760, %v1348_v45 }
  0x1e   :  { %v211_v10 = vand.u32 4294901760, %v210_v8  ;;  %v1158_v25 = vpack.c.bf16 %v216_v2, %v209_v0  ;;  %v224_v26 = vsub.f32 %v1339_v41, %v223_v14  ;;  %v237_v33 = vand.u32 4294901760, %v1351_v46 }
  0x1f   :  { %1066 = vmatpush3.bf16.xpose.msra.mxu1 %v1324_v32  ;;  %1138 = vmatpush3.bf16.xpose.msra.mxu0 %v1324_v32  ;;  %v1083_v4 = vpack.c.bf16 %v204_v63, %v197_v61  ;;  %v218_v13 = vand.u32 4294901760, %v217_v9  ;;  %v244_v38 = vand.u32 4294901760, %v1357_v48  ;;  %v1161_v43 = vpack.c.bf16 %v230_v18, %v223_v14 }
  0x20   :  { %1067 = vmatprep.subr.bf16.mxu1 %v1237_v3  ;;  %1139 = vmatprep.subr.bf16.mxu0 %v1237_v3  ;;  %v225_v30 = vand.u32 4294901760, %v224_v26  ;;  %v238_v44 = vsub.f32 %v1351_v46, %v237_v33  ;;  %v251_v57 = vand.u32 4294901760, %v1371_v58  ;;  %v258_v60 = vand.u32 4294901760, %v1373_v59 }
  0x21   :  { %v1086_v19 = vpack.c.bf16 %v218_v13, %v211_v10  ;;  %v1164_v63 = vpack.c.bf16 %v244_v38, %v237_v33  ;;  %v265_v8 = vand.u32 4294901760, %v1394_v6  ;;  %v272_v9 = vand.u32 4294901760, %v1396_v7 }
  0x22   :  { %v252_v0 = vsub.f32 %v1371_v58, %v251_v57  ;;  %v259_v2 = vsub.f32 %v1373_v59, %v258_v60  ;;  %v1167_v13 = vpack.c.bf16 %v258_v60, %v251_v57  ;;  %v279_v26 = vand.u32 4294901760, %v1417_v20 }
  0x23   :  { %v266_v14 = vsub.f32 %v1394_v6, %v265_v8 }
  0x24   :  { %v280_v33 = vsub.f32 %v1417_v20, %v279_v26 }
  0x27   :  { %1069 = vmatpush3.bf16.xpose.msra.mxu1 %v1369_v55  ;;  %1141 = vmatpush3.bf16.xpose.msra.mxu0 %v1369_v55 }
  0x28   :  { %1070 = vmatprep.subr.bf16.mxu1 %v1237_v3  ;;  %1142 = vmatprep.subr.bf16.mxu0 %v1237_v3 }
  0x2f   :  { %1072 = vmatpush3.bf16.xpose.msra.mxu1 %v1389_v1  ;;  %1144 = vmatpush3.bf16.xpose.msra.mxu0 %v1389_v1 }
  0x30   :  { %1073 = vmatprep.subr.bf16.mxu1 %v1237_v3  ;;  %1145 = vmatprep.subr.bf16.mxu0 %v1237_v3 }
  0x37   :  { %1075 = vmatpush3.bf16.xpose.msra.mxu1 %v1415_v17  ;;  %1147 = vmatpush3.bf16.xpose.msra.mxu0 %v1415_v17 }
  0x38   :  { %1076 = vmatprep.subr.bf16.mxu1 %v1237_v3  ;;  %1148 = vmatprep.subr.bf16.mxu0 %v1237_v3 }
  0x3f   :  { %1078 = vmatpush3.bf16.xpose.msra.mxu1 %v1433_v29  ;;  %1150 = vmatpush3.bf16.xpose.msra.mxu0 %v1433_v29 }
  0x40   :  { %1079 = vmatprep.subr.bf16.mxu1 %v1237_v3  ;;  %1151 = vmatprep.subr.bf16.mxu0 %v1237_v3 }
  0x46   :  { %878 = vmatmul.mubr.f32.vlgmr.msra.gmra.mrb[0].mxu1 %v172_v51  ;;  %983 = vmatmul.mubr.f32.vlgmr.msra.gmra.mrb[0].mxu0 %v170_v28  ;;  %v231_v28 = vsub.f32 %v1348_v45, %v230_v18  ;;  %v245_v51 = vsub.f32 %v1357_v48, %v244_v38  ;;  %v273_v18 = vsub.f32 %v1396_v7, %v272_v9 }
  0x47   :  { %1081 = vmatpush3.bf16.xpose.msra.mxu1 %v1080_v52  ;;  %1153 = vmatpush3.bf16.xpose.msra.mxu0 %v1152_v56  ;;  %v239_v52 = vand.u32 4294901760, %v238_v44 }
  0x48   :  { %1082 = vmatprep.subr.bf16.mxu1 %v1237_v3  ;;  %1154 = vmatprep.subr.bf16.mxu0 %v1237_v3  ;;  %v232_v31 = vand.u32 4294901760, %v231_v28  ;;  %v246_v56 = vand.u32 4294901760, %v245_v51  ;;  %v286_v28 = vand.u32 4294901760, %v1419_v21 }
  0x49   :  { %912 = vmatprep.mubr.msk.f32.mxu1 %vm1238_vm1, %v1239_v23  ;;  %1017 = vmatprep.mubr.msk.f32.mxu0 %vm1238_vm1, %v1239_v23 }
  0x4a   :  { %v1089_v42 = vpack.c.bf16 %v232_v31, %v225_v30  ;;  %v1092_v61 = vpack.c.bf16 %v246_v56, %v239_v52  ;;  %v1170_v31 = vpack.c.bf16 %v272_v9, %v265_v8  ;;  %v287_v38 = vsub.f32 %v1419_v21, %v286_v28 }
  0x4b   :  { %v1173_v51 = vpack.c.bf16 %v286_v28, %v279_v26 }
  0x4f   :  { %1084 = vmatpush3.bf16.xpose.msra.mxu1 %v1083_v4  ;;  %1156 = vmatpush3.bf16.xpose.msra.mxu0 %v1155_v5  ;;  %v253_v4 = vand.u32 4294901760, %v252_v0  ;;  %v260_v5 = vand.u32 4294901760, %v259_v2 }
  0x50   :  { %1085 = vmatprep.subr.bf16.mxu1 %v1237_v3  ;;  %1157 = vmatprep.subr.bf16.mxu0 %v1237_v3 }
  0x51   :  { %v1095_v10 = vpack.c.bf16 %v260_v5, %v253_v4 }
  0x57   :  { %1087 = vmatpush3.bf16.xpose.msra.mxu1 %v1086_v19  ;;  %1159 = vmatpush3.bf16.xpose.msra.mxu0 %v1158_v25  ;;  %v267_v19 = vand.u32 4294901760, %v266_v14  ;;  %v274_v25 = vand.u32 4294901760, %v273_v18 }
  0x58   :  { %1088 = vmatprep.subr.bf16.mxu1 %v1237_v3  ;;  %1160 = vmatprep.subr.bf16.mxu0 %v1237_v3 }
  0x59   :  { %v1098_v30 = vpack.c.bf16 %v274_v25, %v267_v19 }
  0x5f   :  { %1090 = vmatpush3.bf16.xpose.msra.mxu1 %v1089_v42  ;;  %1162 = vmatpush3.bf16.xpose.msra.mxu0 %v1161_v43  ;;  %v281_v42 = vand.u32 4294901760, %v280_v33  ;;  %v288_v43 = vand.u32 4294901760, %v287_v38 }
  0x60   :  { %1091 = vmatprep.subr.bf16.mxu1 %v1237_v3  ;;  %1163 = vmatprep.subr.bf16.mxu0 %v1237_v3 }
  0x61   :  { %v1101_v44 = vpack.c.bf16 %v288_v43, %v281_v42 }
  0x67   :  { %1093 = vmatpush3.bf16.xpose.msra.mxu1 %v1092_v61  ;;  %1165 = vmatpush3.bf16.xpose.msra.mxu0 %v1164_v63 }
  0x68   :  { %1094 = vmatprep.subr.bf16.mxu1 %v1237_v3  ;;  %1166 = vmatprep.subr.bf16.mxu0 %v1237_v3 }
  0x6f   :  { %1096 = vmatpush3.bf16.xpose.msra.mxu1 %v1095_v10  ;;  %1168 = vmatpush3.bf16.xpose.msra.mxu0 %v1167_v13 }
  0x70   :  { %1097 = vmatprep.subr.bf16.mxu1 %v1237_v3  ;;  %1169 = vmatprep.subr.bf16.mxu0 %v1237_v3 }
  0x77   :  { %1099 = vmatpush3.bf16.xpose.msra.mxu1 %v1098_v30  ;;  %1171 = vmatpush3.bf16.xpose.msra.mxu0 %v1170_v31 }
  0x78   :  { %1100 = vmatprep.subr.bf16.mxu1 %v1237_v3  ;;  %1172 = vmatprep.subr.bf16.mxu0 %v1237_v3 }
  0x7f   :  { %1102 = vmatpush3.bf16.xpose.msra.mxu1 %v1101_v44  ;;  %1174 = vmatpush3.bf16.xpose.msra.mxu0 %v1173_v51 }
  0x80   :  { %1103 = vmatprep.subr.bf16.mxu1 %v1237_v3  ;;  %1175 = vmatprep.subr.bf16.mxu0 %v1237_v3 }
  0x86   :  { %913 = vmatmul.mubr.f32.vlgmr.msra.gmra.mrb[0].mxu1 %v1413_v15  ;;  %1018 = vmatmul.mubr.f32.vlgmr.msra.gmra.mrb[0].mxu0 %v1413_v15 }
  0x87   :  { %1105 = vmatpush3.bf16.xpose.msra.mxu1 %v1104_v47  ;;  %1177 = vmatpush3.bf16.xpose.msra.mxu0 %v1279_v11  ;;  %v34_v11 = vstv %s1561_s2 }
  0x88   :  { %1106 = vmatprep.subr.bf16.mxu1 %v1237_v3  ;;  %1178 = vmatprep.subr.bf16.mxu0 %v1237_v3 }
  0x89   :  { %947 = vmatprep.mubr.msk.f32.mxu1 %vm1238_vm1, %v1239_v23  ;;  %1052 = vmatprep.mubr.msk.f32.mxu0 %vm1238_vm1, %v1239_v23 }
  0x8f   :  { %1108 = vmatpush3.bf16.xpose.msra.mxu1 %v1107_v49  ;;  %1180 = vmatpush3.bf16.xpose.msra.mxu0 %v1291_v16 }
  0x90   :  { %1109 = vmatprep.subr.bf16.mxu1 %v1237_v3  ;;  %1181 = vmatprep.subr.bf16.mxu0 %v1237_v3 }
  0x97   :  { %1111 = vmatpush3.bf16.xpose.msra.mxu1 %v1110_v50  ;;  %1183 = vmatpush3.bf16.xpose.msra.mxu0 %v1309_v24 }
  0x98   :  { %1112 = vmatprep.subr.bf16.mxu1 %v1237_v3  ;;  %1184 = vmatprep.subr.bf16.mxu0 %v1237_v3 }
  0x9f   :  { %1114 = vmatpush3.bf16.xpose.msra.mxu1 %v1113_v53  ;;  %1186 = vmatpush3.bf16.xpose.msra.mxu0 %v1324_v32 }
  0xa0   :  { %1115 = vmatprep.subr.bf16.mxu1 %v1237_v3  ;;  %1187 = vmatprep.subr.bf16.mxu0 %v1237_v3 }
  0xa7   :  { %1117 = vmatpush3.bf16.xpose.msra.mxu1 %v1116_v54  ;;  %1189 = vmatpush3.bf16.xpose.msra.mxu0 %v1369_v55 }
  0xa8   :  { %1118 = vmatprep.subr.bf16.mxu1 %v1237_v3  ;;  %1190 = vmatprep.subr.bf16.mxu0 %v1237_v3 }
  0xaf   :  { %1120 = vmatpush3.bf16.xpose.msra.mxu1 %v1119_v62  ;;  %1192 = vmatpush3.bf16.xpose.msra.mxu0 %v1389_v1 }
  0xb0   :  { %1121 = vmatprep.subr.bf16.mxu1 %v1237_v3  ;;  %1193 = vmatprep.subr.bf16.mxu0 %v1237_v3 }
  0xb7   :  { %1123 = vmatpush3.bf16.xpose.msra.mxu1 %v1122_v12  ;;  %1195 = vmatpush3.bf16.xpose.msra.mxu0 %v1415_v17 }
  0xb8   :  { %1124 = vmatprep.subr.bf16.mxu1 %v1237_v3  ;;  %1196 = vmatprep.subr.bf16.mxu0 %v1237_v3 }
  0xbf   :  { %1126 = vmatpush3.bf16.xpose.msra.mxu1 %v1125_v27  ;;  %1198 = vmatpush3.bf16.xpose.msra.mxu0 %v1433_v29 }
  0xc6   :  { %948 = vmatmul.mubr.f32.vlgmr.msra.gmra.mrb[0].mxu1 %v1422_v22  ;;  %1053 = vmatmul.mubr.f32.vlgmr.msra.gmra.mrb[0].mxu0 %v1413_v15 }
 0x199   :  { %v429_v16 = vpop.f32.mrb[0].mxu1  ;;  %v724_v23 = vpop.f32.mrb[0].mxu0 }
 0x19a   :  { %v1199_v24 = vadd.f32 %v429_v16, %v34_v11  ;;  %v949_v3 = vpop.f32.mrb[1].mxu1  ;;  %v1054_v32 = vpop.f32.mrb[1].mxu0 }
 0x19c   :  { %v1200_v34 = vadd.f32 %v1199_v24, %v724_v23 }
 0x19e   :  { %728 = vst [vmem:[#allocation3] sm:$0x1] %v1200_v34 }
 0x19f   :  { %1224 = shalt.err (!%p1221_p4)
}
 0x1a0   :  { %s1225_s24 = scalar_lea.hbm %s1562_s3, 16 }
 0x1a1   :  { %p1226_p5 = scmp.ne.s32.totalorder %s1562_s3, %s1225_s24  ;;  %p1229_p6 = scmp.lt.u32.totalorder %s1225_s24, %s1562_s3 }
 0x1a3   :  { %p1231_p7 = pnand %p1229_p6, %p1226_p5 }
 0x1a5   :  { %1234 = shalt.err (!%p1231_p7)
}
 0x1a6   :  { %738 = dma.vmem_to_hbm [thread:$0]  %s736_s20, 16, %s1562_s3, [#allocation4]  }
 0x1a7   :  { %1235 = dma.done.wait [#allocation4], 16  }
 0x1a8   :  { %1236 = vsyncadd [#allocation4], 4294967280 }
 0x1a9   :  { %742 = vsyncpa [#allocation4], 1 }

</bundles_post_ra>
